<compile_context>
chip_gen: v5e
topology: v5e:2x2
jax: 0.10.0
libtpu: 0.0.40
codegen_flags: <defaults>
</compile_context>

<pallas_src>
import jax
import jax.numpy as jnp
import numpy as np
from jax.experimental import pallas as pl
from jax.experimental.pallas import tpu as pltpu

_BN_EPS = 1e-5
_COS_EPS = 1e-8


# ---------------------------------------------------------------------------
# Single fused kernel:
#   input_mlp (BN pre-folded) -> PReLU -> Linear2
#   node_projection
#   cosine-sim adjacency (Gram matmul, no transpose of the wide visual tensor)
#   collapsed gcn_face + gcn_projection_face
#   final sum (constant biases come in as one SMEM scalar)
# ---------------------------------------------------------------------------
def _linear_face_kernel(x_ref, vis_ref, w1_ref, b1_ref, w2_ref, b2_ref,
                        wnode_ref, vface_ref, a_ref, c_ref, out_ref):
    n = x_ref.shape[0]

    # input_mlp: Linear(2,32) [eval-BN folded in] -> PReLU -> Dropout(0) -> Linear(32,32)
    h = jnp.dot(x_ref[...], w1_ref[...], preferred_element_type=jnp.float32) + b1_ref[...]
    a = a_ref[0, 0]                                    # shared PReLU slope (SMEM scalar)
    h = jnp.where(h > 0, h, a * h)
    h = jnp.dot(h, w2_ref[...], preferred_element_type=jnp.float32) + b2_ref[...]

    # node_projection (its bias is folded into the SMEM constant c_ref).
    s_node = jnp.dot(h, wnode_ref[...], preferred_element_type=jnp.float32)   # (N, 1)

    # Collapsed gcn_face branch: score contribution = adj @ (h @ (W_gcn @ w_proj)).
    w_face = jnp.dot(h, vface_ref[...], preferred_element_type=jnp.float32)   # (N, 1)

    # Cosine-similarity adjacency from ONE Gram matmul, contracting last dims of
    # both operands (no explicit transpose of the (N, Dv) visual tensor), with
    # normalization derived from the Gram diagonal:
    #   adj = diag(inv) @ G @ diag(inv)   =>   adj @ w = inv * (G @ (inv * w))
    vis = vis_ref[...]                                                        # (N, Dv)
    g = jax.lax.dot_general(vis, vis, (((1,), (1,)), ((), ())),
                            preferred_element_type=jnp.float32)               # (N, N)
    rows = jax.lax.broadcasted_iota(jnp.int32, (n, n), 0)
    cols = jax.lax.broadcasted_iota(jnp.int32, (n, n), 1)
    diag = jnp.sum(jnp.where(rows == cols, g, 0.0), axis=1, keepdims=True)    # (N, 1)
    inv = jax.lax.rsqrt(diag + _COS_EPS)
    s_face = inv * jnp.dot(g, inv * w_face, preferred_element_type=jnp.float32)

    # Only HBM write of the whole forward pass.
    out_ref[...] = s_node + s_face + c_ref[0, 0]


def linear_face_forward(params, x, vis_face):
    n = x.shape[0]

    # Fold eval-mode BatchNorm1d into Linear1 (exact affine fold).
    scale = params["bn_gamma"] * jax.lax.rsqrt(params["bn_var"] + _BN_EPS)    # (1, 32)
    w1f = params["w1_t"] * scale                                              # (2, 32)
    b1f = (params["b1"] - params["bn_mean"]) * scale + params["bn_beta"]      # (1, 32)

    # Collapse CMCosConv's linear + gcn_projection_face (only scores are returned):
    #   ((adj @ h) @ Wg + bg) @ wf + bf  ==  adj @ (h @ (Wg @ wf)) + (bg @ wf + bf)
    v_face = params["gcn_face_w_t"] @ params["wface_t"]                       # (32, 1)
    c_total = (params["bnode"] + params["gcn_face_b"] @ params["wface_t"]
               + params["bface"])                                             # (1, 1)

    vmem = pl.BlockSpec(memory_space=pltpu.MemorySpace.VMEM)
    smem = pl.BlockSpec(memory_space=pltpu.MemorySpace.SMEM)

    scores = pl.pallas_call(
        _linear_face_kernel,
        out_shape=jax.ShapeDtypeStruct((n, 1), jnp.float32),
        in_specs=[vmem, vmem, vmem, vmem, vmem, vmem, vmem, vmem, smem, smem],
        out_specs=vmem,
    )(x, vis_face, w1f, b1f, params["w2_t"], params["b2"],
      params["wnode_t"], v_face, params["prelu_a"], c_total)

    return scores[:, 0]                                                       # .squeeze()


# Pure-JAX reference with the original (unfolded) math, for a correctness check.
def linear_face_reference(p, x, vis_face):
    h = x @ p["w1_t"] + p["b1"]
    h = (h - p["bn_mean"]) * jax.lax.rsqrt(p["bn_var"] + _BN_EPS) * p["bn_gamma"] + p["bn_beta"]
    h = jnp.where(h > 0, h, p["prelu_a"] * h)
    h = h @ p["w2_t"] + p["b2"]
    node_score = h @ p["wnode_t"] + p["bnode"]

    vn = vis_face * jax.lax.rsqrt(jnp.sum(vis_face * vis_face, axis=-1, keepdims=True)
                                  + _COS_EPS)
    face_feat = ((vn @ vn.T) @ h) @ p["gcn_face_w_t"] + p["gcn_face_b"]
    face_score = face_feat @ p["wface_t"] + p["bface"]
    return (node_score + face_score)[:, 0]


def init_params(key):
    ks = jax.random.split(key, 12)
    r = lambda k, shape, s=0.1: (s * jax.random.normal(k, shape)).astype(jnp.float32)
    # PyTorch Linear weights are (out, in); store pre-transposed (in, out).
    return {
        "w1_t": r(ks[0], (2, 32)),
        "b1": r(ks[1], (1, 32)),
        "bn_gamma": 1.0 + r(ks[2], (1, 32)),
        "bn_beta": r(ks[3], (1, 32)),
        "bn_mean": r(ks[4], (1, 32)),
        "bn_var": 1.0 + jnp.abs(r(ks[5], (1, 32))),
        "prelu_a": jnp.full((1, 1), 0.25, jnp.float32),
        "w2_t": r(ks[6], (32, 32)),
        "b2": r(ks[7], (1, 32)),
        "wnode_t": r(ks[8], (32, 1)),
        "bnode": jnp.zeros((1, 1), jnp.float32),
        "gcn_face_w_t": r(ks[9], (32, 32)),
        "gcn_face_b": r(ks[10], (1, 32)),
        "wface_t": r(ks[11], (32, 1)),
        "bface": jnp.zeros((1, 1), jnp.float32),
    }


if __name__ == "__main__":
    key = jax.random.PRNGKey(0)
    k_params, k_x, k_face = jax.random.split(key, 3)

    N = 8                     # nodes in the batched face graph
    VISUAL_DIM_FACE = 512     # module hard-codes CMCosConv(32, 32, 512)

    params = init_params(k_params)
    x = jax.random.normal(k_x, (N, 2), dtype=jnp.float32)            # node features
    vis_face = jax.random.normal(k_face, (N, VISUAL_DIM_FACE), jnp.float32)

    fwd = jax.jit(linear_face_forward)
    out = jax.block_until_ready(fwd(params, x, vis_face))
    ref = jax.block_until_ready(linear_face_reference(params, x, vis_face))

    assert out.shape == (N,), out.shape
    np.testing.assert_allclose(np.asarray(out), np.asarray(ref), rtol=1e-4, atol=1e-4)
    print("KERNEL_OK")
</pallas_src>

<mosaic_0001>
module attributes {stable_mosaic.version = 11 : i64} {
  func.func @_linear_face_kernel(%arg0: memref<8x2xf32, #tpu.memory_space<vmem>>, %arg1: memref<8x512xf32, #tpu.memory_space<vmem>>, %arg2: memref<2x32xf32, #tpu.memory_space<vmem>>, %arg3: memref<1x32xf32, #tpu.memory_space<vmem>>, %arg4: memref<32x32xf32, #tpu.memory_space<vmem>>, %arg5: memref<1x32xf32, #tpu.memory_space<vmem>>, %arg6: memref<32x1xf32, #tpu.memory_space<vmem>>, %arg7: memref<32x1xf32, #tpu.memory_space<vmem>>, %arg8: memref<1x1xf32, #tpu.memory_space<smem>>, %arg9: memref<1x1xf32, #tpu.memory_space<smem>>, %arg10: memref<8x1xf32, #tpu.memory_space<vmem>>) attributes {dimension_semantics = [], scalar_prefetch = 0 : i64, scratch_operands = 0 : i64, tpu.core_type = #tpu.core_type<tc>} {
    %c0 = arith.constant 0 : index
    %c0_0 = arith.constant 0 : index
    %0 = vector.load %arg0[%c0, %c0_0] : memref<8x2xf32, #tpu.memory_space<vmem>>, vector<8x2xf32>
    %c0_1 = arith.constant 0 : index
    %c0_2 = arith.constant 0 : index
    %1 = vector.load %arg2[%c0_1, %c0_2] : memref<2x32xf32, #tpu.memory_space<vmem>>, vector<2x32xf32>
    %cst = arith.constant dense<0.000000e+00> : vector<8x32xf32>
    %2 = tpu.matmul %0, %1, %cst {dimension_numbers = #tpu.dot_dimension_numbers<[1], [0], [0], [1], [0, 0, 1, 1], [], []>} : vector<8x2xf32>, vector<2x32xf32>, vector<8x32xf32> -> vector<8x32xf32>
    %c0_3 = arith.constant 0 : index
    %c0_4 = arith.constant 0 : index
    %3 = vector.load %arg3[%c0_3, %c0_4] : memref<1x32xf32, #tpu.memory_space<vmem>>, vector<1x32xf32>
    %4 = vector.broadcast %3 : vector<1x32xf32> to vector<8x32xf32>
    %5 = arith.addf %2, %4 : vector<8x32xf32>
    %c0_5 = arith.constant 0 : index
    %c0_6 = arith.constant 0 : index
    %6 = memref.load %arg8[%c0_5, %c0_6] : memref<1x1xf32, #tpu.memory_space<smem>>
    %cst_7 = arith.constant 0.000000e+00 : f32
    %7 = vector.broadcast %cst_7 : f32 to vector<8x32xf32>
    %8 = arith.cmpf ogt, %5, %7 : vector<8x32xf32>
    %9 = vector.broadcast %6 : f32 to vector<8x32xf32>
    %10 = arith.mulf %9, %5 : vector<8x32xf32>
    %11 = arith.select %8, %5, %10 : vector<8x32xi1>, vector<8x32xf32>
    %c0_8 = arith.constant 0 : index
    %c0_9 = arith.constant 0 : index
    %12 = vector.load %arg4[%c0_8, %c0_9] : memref<32x32xf32, #tpu.memory_space<vmem>>, vector<32x32xf32>
    %cst_10 = arith.constant dense<0.000000e+00> : vector<8x32xf32>
    %13 = tpu.matmul %11, %12, %cst_10 {dimension_numbers = #tpu.dot_dimension_numbers<[1], [0], [0], [1], [0, 0, 1, 1], [], []>} : vector<8x32xf32>, vector<32x32xf32>, vector<8x32xf32> -> vector<8x32xf32>
    %c0_11 = arith.constant 0 : index
    %c0_12 = arith.constant 0 : index
    %14 = vector.load %arg5[%c0_11, %c0_12] : memref<1x32xf32, #tpu.memory_space<vmem>>, vector<1x32xf32>
    %15 = vector.broadcast %14 : vector<1x32xf32> to vector<8x32xf32>
    %16 = arith.addf %13, %15 : vector<8x32xf32>
    %c0_13 = arith.constant 0 : index
    %c0_14 = arith.constant 0 : index
    %17 = vector.load %arg6[%c0_13, %c0_14] : memref<32x1xf32, #tpu.memory_space<vmem>>, vector<32x1xf32>
    %cst_15 = arith.constant dense<0.000000e+00> : vector<8x1xf32>
    %18 = tpu.matmul %16, %17, %cst_15 {dimension_numbers = #tpu.dot_dimension_numbers<[1], [0], [0], [1], [0, 0, 1, 1], [], []>} : vector<8x32xf32>, vector<32x1xf32>, vector<8x1xf32> -> vector<8x1xf32>
    %c0_16 = arith.constant 0 : index
    %c0_17 = arith.constant 0 : index
    %19 = vector.load %arg7[%c0_16, %c0_17] : memref<32x1xf32, #tpu.memory_space<vmem>>, vector<32x1xf32>
    %cst_18 = arith.constant dense<0.000000e+00> : vector<8x1xf32>
    %20 = tpu.matmul %16, %19, %cst_18 {dimension_numbers = #tpu.dot_dimension_numbers<[1], [0], [0], [1], [0, 0, 1, 1], [], []>} : vector<8x32xf32>, vector<32x1xf32>, vector<8x1xf32> -> vector<8x1xf32>
    %c0_19 = arith.constant 0 : index
    %c0_20 = arith.constant 0 : index
    %21 = vector.load %arg1[%c0_19, %c0_20] : memref<8x512xf32, #tpu.memory_space<vmem>>, vector<8x512xf32>
    %cst_21 = arith.constant dense<0.000000e+00> : vector<8x8xf32>
    %22 = tpu.matmul %21, %21, %cst_21 {dimension_numbers = #tpu.dot_dimension_numbers<[1], [1], [0], [0], [0, 0, 1, 0], [], []>} : vector<8x512xf32>, vector<8x512xf32>, vector<8x8xf32> -> vector<8x8xf32>
    %23 = tpu.iota {dimensions = array<i32: 0>} : vector<8x8xi32>
    %24 = tpu.iota {dimensions = array<i32: 1>} : vector<8x8xi32>
    %25 = arith.cmpi eq, %23, %24 : vector<8x8xi32>
    %cst_22 = arith.constant 0.000000e+00 : f32
    %26 = vector.broadcast %cst_22 : f32 to vector<8x8xf32>
    %27 = arith.select %25, %22, %26 : vector<8x8xi1>, vector<8x8xf32>
    %cst_23 = arith.constant dense<0.000000e+00> : vector<8xf32>
    %28 = vector.multi_reduction <add>, %27, %cst_23 [1] : vector<8x8xf32> to vector<8xf32>
    %29 = vector.shape_cast %28 : vector<8xf32> to vector<8x1xf32>
    %cst_24 = arith.constant 9.99999993E-9 : f32
    %30 = vector.broadcast %cst_24 : f32 to vector<8x1xf32>
    %31 = arith.addf %29, %30 : vector<8x1xf32>
    %32 = math.rsqrt %31 : vector<8x1xf32>
    %33 = arith.mulf %32, %20 : vector<8x1xf32>
    %cst_25 = arith.constant dense<0.000000e+00> : vector<8x1xf32>
    %34 = tpu.matmul %22, %33, %cst_25 {dimension_numbers = #tpu.dot_dimension_numbers<[1], [0], [0], [1], [0, 0, 1, 1], [], []>} : vector<8x8xf32>, vector<8x1xf32>, vector<8x1xf32> -> vector<8x1xf32>
    %35 = arith.mulf %32, %34 : vector<8x1xf32>
    %36 = arith.addf %18, %35 : vector<8x1xf32>
    %c0_26 = arith.constant 0 : index
    %c0_27 = arith.constant 0 : index
    %37 = memref.load %arg9[%c0_26, %c0_27] : memref<1x1xf32, #tpu.memory_space<smem>>
    %38 = vector.broadcast %37 : f32 to vector<8x1xf32>
    %39 = arith.addf %36, %38 : vector<8x1xf32>
    %c0_28 = arith.constant 0 : index
    %c0_29 = arith.constant 0 : index
    %40 = vector.load %arg10[%c0_28, %c0_29] : memref<8x1xf32, #tpu.memory_space<vmem>>, vector<8x1xf32>
    tpu.vector_store %arg10[%c0_28, %c0_29], %39 {strides = array<i32>} : memref<8x1xf32, #tpu.memory_space<vmem>>, vector<8x1xf32>,
    return
  }
}

</mosaic_0001>

<bundles_post_ra>
// kernel: linear_face_forward.1
= control target key start
LH: loop header
LB: loop body
LE: loop exit
PB: predicated region body
PF: predicated region fallthrough
CT: control target
= control target key end

     0   :  { %vm47_vm0 = vcmask 1041408   ;;  %vm43_vm1 = vcmask 15360   ;;  %vm84_vm3 = vcmask 261120   ;;  %v223_v28 = vlaneseq  ;;  %s437_s2 = inlined_call_operand.vmem [shape: f32[2,32], index: 2, kind: input, shape index: {}]   ;;  %s438_s0 = inlined_call_operand.vmem [shape: f32[8,2], index: 0, kind: input, shape index: {}]   ;;  %s439_s1 = inlined_call_operand.vmem [shape: f32[8,512], index: 1, kind: input, shape index: {}]   ;;  %s440_s4 = inlined_call_operand.vmem [shape: f32[32,32], index: 4, kind: input, shape index: {}]   ;;  %s441_s3 = inlined_call_operand.vmem [shape: f32[1,32], index: 3, kind: input, shape index: {}]   ;;  %s442_s5 = inlined_call_operand.vmem [shape: f32[1,32], index: 5, kind: input, shape index: {}]   ;;  %s443_s7 = inlined_call_operand.vmem [shape: f32[32,1], index: 7, kind: input, shape index: {}]   ;;  %s444_s6 = inlined_call_operand.vmem [shape: f32[32,1], index: 6, kind: input, shape index: {}]   ;;  %s445_s8 = inlined_call_operand.<no memory space> [shape: f32[1,1], index: 8, kind: input, shape index: {}]   ;;  %s446_s9 = inlined_call_operand.<no memory space> [shape: f32[1,1], index: 9, kind: input, shape index: {}]   ;;  %s447_s10 = inlined_call_operand.vmem [shape: f32[8,1], index: 10, kind: output, shape index: {}]  }
   0x1   :  { %v38_v0 = vld [vmem:[%s437_s2] sm:$0x3]  ;;  %v141_v3 = vld [vmem:[%s439_s1 + $0x10] sm:$0xff]  ;;  %v79_v4 = vld [vmem:[%s440_s4 + $0x18] sm:$0xff]  ;;  %v73_v15 = vstv %s445_s8  ;;  %vm229_vm5 = vcmask 64512   ;;  %vm292_vm9 = vcmask 7168  }
   0x2   :  { %v37_v1 = vld [vmem:[%s438_s0] sm:$0xff]  ;;  %298 = vmatpush.msk.msra.mxu0 %vm47_vm0, %v38_v0  ;;  %100 = vmatpush.msra.mxu1 %v79_v4  ;;  %v78_v5 = vld [vmem:[%s440_s4 + $0x10] sm:$0xff]  ;;  %v140_v6 = vld [vmem:[%s439_s1 + $0x8] sm:$0xff]  ;;  %v224_v32 = vshrl.u32 %v223_v28, 7  ;;  %v226_v33 = vand.u32 127, %v223_v28  ;;  %v290_v53 = vstv %s446_s9 }
   0x3   :  { %v139_v2 = vld [vmem:[%s439_s1] sm:$0xff]  ;;  %299 = vmatmul.msk.f32.vlgmr.msra.gmra.mxu0 %vm43_vm1, %v37_v1  ;;  %v77_v7 = vld [vmem:[%s440_s4 + $0x8] sm:$0xff]  ;;  %v142_v9 = vld [vmem:[%s439_s1 + $0x18] sm:$0xff] }
   0x4   :  { %158 = vmatpush.xpose.msra.mxu3 %v139_v2  ;;  %101 = vmatpush.msra.mxu1 %v78_v5  ;;  %v76_v8 = vld [vmem:[%s440_s4] sm:$0xff]  ;;  %v115_v10 = vld [vmem:[%s443_s7 + $0x18] sm:$0xff]  ;;  %v114_v12 = vld [vmem:[%s443_s7 + $0x10] sm:$0xff]  ;;  %vm227_vm4 = vcmp.eq.s32.totalorder %v224_v32, %v226_v33 }
   0x5   :  { %178 = vmatpush.xpose.msrb.mxu0 %v140_v6  ;;  %v111_v11 = vld [vmem:[%s444_s6 + $0x18] sm:$0xff]  ;;  %131 = vmatpush.msra.mxu2 %v115_v10  ;;  %v304_v13 = vld [vmem:[%s441_s3] ss:$0 sm:$0xff]  ;;  %v110_v19 = vld [vmem:[%s444_s6 + $0x10] sm:$0xff] }
   0x6   :  { %102 = vmatpush.msra.mxu1 %v77_v7  ;;  %v113_v20 = vld [vmem:[%s443_s7 + $0x8] sm:$0xff]  ;;  %v112_v22 = vld [vmem:[%s443_s7] sm:$0xff] }
   0x7   :  { %159 = vmatmul.f32.vlgmr.msra.gmra.mxu3 %v139_v2  ;;  %132 = vmatpush.msra.mxu2 %v114_v12  ;;  %v109_v21 = vld [vmem:[%s444_s6 + $0x8] sm:$0xff]  ;;  %v108_v23 = vld [vmem:[%s444_s6] sm:$0xff] }
   0x8   :  { %198 = vmatpush.xpose.msrb.mxu3 %v141_v3  ;;  %103 = vmatpush.msra.mxu1 %v76_v8  ;;  %v305_v25 = vld [vmem:[%s442_s5] ss:$0 sm:$0xff] }
   0x9   :  { %281 = vmatpush.msra.mxu0 %v111_v11  ;;  %133 = vmatpush.msra.mxu2 %v113_v20 }
   0xa   :  { %218 = vmatpush.xpose.msrb.mxu1 %v142_v9 }
   0xb   :  { %179 = vmatmul.f32.vlgmr.msrb.gmra.mxu0 %v140_v6  ;;  %134 = vmatpush.msra.mxu2 %v112_v22 }
   0xc   :  { %282 = vmatpush.msra.mxu0 %v110_v19 }
   0xe   :  { %283 = vmatpush.msra.mxu0 %v109_v21 }
   0xf   :  { %199 = vmatmul.f32.vlgmr.msrb.gmra.mxu3 %v141_v3 }
  0x10   :  { %284 = vmatpush.msra.mxu0 %v108_v23 }
  0x80   :  { %v68_v14 = vpop.f32.mrf.mxu0 }
  0x81   :  { %v69_v16 = vadd.f32 %v304_v13, %v68_v14 }
  0x83   :  { %v74_v17 = vmul.f32 %v73_v15, %v69_v16  ;;  %vm72_vm2 = vcmp.gt.f32.partialorder %v69_v16, 0.0 }
  0x85   :  { %v75_v18 = vsel %vm72_vm2, %v69_v16, %v74_v17 }
  0x86   :  { %300 = vmatmul.msk.f32.vlgmr.msra.gmra.mxu1 %vm84_vm3, %v75_v18 }
  0x88   :  { %v180_v26 = vpop.f32.mrf.mxu0 }
  0x8a   :  { %v160_v24 = vpop.f32.mrf.mxu3 }
  0x8b   :  { %v181_v30 = vadd.f32 %v180_v26, %v160_v24 }
  0x8e   :  { %219 = vmatmul.f32.vlgmr.msrb.gmra.mxu1 %v142_v9 }
  0x92   :  { %v200_v31 = vpop.f32.mrf.mxu3 }
  0x93   :  { %v201_v34 = vadd.f32 %v200_v31, %v181_v30 }
 0x103   :  { %v105_v27 = vpop.f32.mrf.mxu1 }
 0x104   :  { %v106_v29 = vadd.f32 %v305_v25, %v105_v27 }
 0x106   :  { %301 = vmatmul.msk.f32.vlgmr.msra.gmra.mxu2 %vm84_vm3, %v106_v29  ;;  %303 = vmatmul.msk.f32.vlgmr.msra.gmra.mxu0 %vm84_vm3, %v106_v29 }
 0x10b   :  { %v220_v35 = vpop.f32.mrf.mxu1 }
 0x10c   :  { %v221_v36 = vadd.f32 %v220_v35, %v201_v34 }
 0x10e   :  { %v228_v37 = vsel %vm227_vm4, %v221_v36, 0.0 }
 0x10f   :  { %v230_v38 = vsel %vm229_vm5, %v228_v37, 0.0 }
 0x110   :  { %231 = vadd.xlane.f32.xlu0 %v230_v38 }
 0x183   :  { %v232_v39 = vpop.xlane.xlu0 %231  ;;  %v286_v52 = vpop.f32.mrf.mxu0 }
 0x184   :  { %v233_v40 = vadd.f32 1e-08, %v232_v39 }
 0x186   :  { %306 = vrsqrt.f32 %v233_v40  ;;  %vm240_vm7 = vweird.f32 %v233_v40 }
 0x189   :  { %v136_v47 = vpop.f32.mrf.mxu2 }
 0x18c   :  { %v307_v41 = vpop.eup %306 }
 0x18d   :  { %v235_v42 = vmul.f32 %v307_v41, %v233_v40  ;;  %vm241_vm6 = vweird.f32 %v307_v41 }
 0x18e   :  { %vm242_vm8 = vmor %vm240_vm7, %vm241_vm6 }
 0x18f   :  { %v236_v43 = vmul.f32 %v307_v41, %v235_v42 }
 0x191   :  { %v237_v44 = vmul.f32 0.5, %v236_v43 }
 0x193   :  { %v238_v45 = vsub.f32 1.5, %v237_v44 }
 0x195   :  { %v239_v46 = vmul.f32 %v307_v41, %v238_v45 }
 0x197   :  { %v243_v48 = vsel %vm242_vm8, %v307_v41, %v239_v46 }
 0x198   :  { %v244_v49 = vmul.f32 %v243_v48, %v136_v47 }
 0x19a   :  { %263 = vmatpush.msrb.mxu2 %v244_v49 }
 0x19b   :  { %302 = vmatmul.msk.f32.vlgmr.msrb.gmra.mxu2 %vm229_vm5, %v221_v36 }
 0x21e   :  { %v265_v50 = vpop.f32.mrf.mxu2 }
 0x21f   :  { %v268_v51 = vmul.f32 %v265_v50, %v243_v48 }
 0x221   :  { %v287_v54 = vadd.f32 %v286_v52, %v268_v51 }
 0x223   :  { %v291_v55 = vadd.f32 %v290_v53, %v287_v54 }
 0x225   :  { %293 = vst.msk [vmem:[%s447_s10] sm:$0xff] %vm292_vm9, %v291_v55 }

</bundles_post_ra>
